<compile_context>
chip_gen: v7x
topology: tpu7x:2x2x1
jax: 0.10.0
libtpu: 0.0.40
codegen_flags: <defaults>
</compile_context>

<pallas_src>
import functools

import jax
import jax.numpy as jnp
from jax.experimental import pallas as pl
from jax.experimental.pallas import tpu as pltpu


def _bvdkd_kernel(nf_ref, pt_ref, ps_ref, out_ref, *, a, hw, tile_hw, mask_tail):
    """One (n, j) tile: emit sum over the tile of term + variance as a partial."""
    j = pl.program_id(1)

    nf = nf_ref[0].astype(jnp.float32)   # new_fea tile  (C, tile_hw)
    pt = pt_ref[0].astype(jnp.float32)   # teacher tile  (C, tile_hw)
    ps = ps_ref[0].astype(jnp.float32)   # student tile  (C, tile_hw)

    # log_softmax(new_fea) over the channel (sublane) axis.
    nf_sh = nf - jnp.max(nf, axis=0, keepdims=True)
    ls = nf_sh - jnp.log(jnp.sum(jnp.exp(nf_sh), axis=0, keepdims=True))

    # softmax over channels: exp, then a single reciprocal per lane column
    # (1, tile_hw) and a VPU multiply — avoids per-element EUP divides.
    pt_e = jnp.exp(pt - jnp.max(pt, axis=0, keepdims=True))
    st = pt_e * pl.reciprocal(jnp.sum(pt_e, axis=0, keepdims=True), approx=False)

    ps_e = jnp.exp(ps - jnp.max(ps, axis=0, keepdims=True))
    ss = ps_e * pl.reciprocal(jnp.sum(ps_e, axis=0, keepdims=True), approx=False)

    # elementwise MSE terms (reduction='none')
    d_loss = ls - st
    loss = d_loss * d_loss
    d_var = ls - ss
    variance = d_var * d_var

    if a == 1.0:
        term = loss                                    # skip exp(-var) entirely
    else:
        term = loss * (a + (1.0 - a) * jnp.exp(-variance))

    # mean(term) and mean(variance) share the same denominator -> one sum.
    contrib = term + variance

    if mask_tail:
        lane = jax.lax.broadcasted_iota(jnp.int32, contrib.shape, 1)
        contrib = jnp.where(j * tile_hw + lane < hw, contrib, 0.0)

    # Single cross-lane/sublane reduction per step; per-(n, j) partial output.
    out_ref[0] = jnp.sum(contrib, keepdims=True)


def _vmem_budgets():
    """Return (io_budget_bytes, vmem_limit_bytes), TPU-generation aware."""
    cap = None
    try:
        cap = getattr(pltpu.get_tpu_info(), "vmem_capacity_bytes", None)
    except Exception:  # pragma: no cover - info query unavailable
        cap = None
    if cap is None:
        cap = 64 * 1024 * 1024                     # conservative: assume v7x VMEM
    if cap >= 128 * 1024 * 1024:                   # v5e / v6e: 128 MiB physical
        return 48 * 1024 * 1024, 96 * 1024 * 1024
    return 24 * 1024 * 1024, 48 * 1024 * 1024      # v7x: 64 MiB per TensorCore


def _choose_tile_hw(hw, c, in_dtype, budget_bytes, vmem_limit_bytes,
                    cap=8192, min_lanes=512):
    """Largest spatial tile within budget; dtype- and sublane-padding-aware."""
    itemsize = jnp.dtype(in_dtype).itemsize
    sub_in = (8 * 4) // itemsize                   # sublane pack: 8 f32 / 16 bf16
    c_in = -(-c // sub_in) * sub_in                # padded channels, input dtype
    c_f32 = -(-c // 8) * 8                         # padded channels, f32 temps
    # 3 inputs x 2 pipeline buffers at input dtype + headroom for ~5 (C, tile)
    # f32 intermediates the compiler materializes across the softmax reductions.
    per_lane = 3 * 2 * c_in * itemsize + 5 * c_f32 * 4
    tile = min(cap, budget_bytes // per_lane)
    # Amortize per-step overhead: prefer >=512 lanes if the real limit allows.
    if tile < min_lanes and per_lane * min_lanes <= int(0.9 * vmem_limit_bytes):
        tile = min_lanes
    tile = max(tile, 128)
    if hw <= tile:
        return hw                                  # full extent is always legal
    return (tile // 128) * 128                     # keep lane dim multiple of 128


def bvdkd_loss(preds_S, preds_T, new_fea, *, alpha_mgd=2e-05, a=1.0, tile_hw=None):
    """JAX/Pallas implementation of BVDKDLoss.forward. Inputs are NCHW."""
    assert preds_S.shape == preds_T.shape == new_fea.shape
    N, C, H, W = preds_T.shape
    HW = H * W

    # NCHW -> (N, C, H*W): contiguous reshape, channels on sublanes, spatial on
    # lanes.  Inputs are NOT upcast here (bf16 stays bf16 -> half the HBM
    # traffic); the kernel upcasts each tile to f32.
    s_rows = preds_S.reshape(N, C, HW)
    t_rows = preds_T.reshape(N, C, HW)
    f_rows = new_fea.reshape(N, C, HW)

    io_budget, vmem_limit = _vmem_budgets()
    if tile_hw is None:
        tile_hw = _choose_tile_hw(HW, C, preds_T.dtype, io_budget, vmem_limit)
    tile_hw = min(int(tile_hw), HW)
    if tile_hw != HW and tile_hw % 128 != 0:
        raise ValueError("tile_hw must equal H*W or be a multiple of 128")

    n_hw = pl.cdiv(HW, tile_hw)
    mask_tail = (HW % tile_hw) != 0

    in_spec = pl.BlockSpec((1, C, tile_hw), lambda n, j: (n, 0, j))
    # One (1,1,1) partial per (n, j) grid point: no in-kernel accumulator, no
    # revisited output block, and both grid axes are "parallel" so the two v7x
    # TensorCores both get work even when N == 1.
    out_spec = pl.BlockSpec((1, 1, 1), lambda n, j: (n * n_hw + j, 0, 0))

    partials = pl.pallas_call(
        functools.partial(_bvdkd_kernel, a=float(a), hw=HW, tile_hw=tile_hw,
                          mask_tail=mask_tail),
        out_shape=jax.ShapeDtypeStruct((N * n_hw, 1, 1), jnp.float32),
        grid_spec=pltpu.PrefetchScalarGridSpec(
            num_scalar_prefetch=0,
            grid=(N, n_hw),
            in_specs=[in_spec, in_spec, in_spec],
            out_specs=out_spec,
        ),
        compiler_params=pltpu.CompilerParams(
            dimension_semantics=("parallel", "parallel"),
            vmem_limit_bytes=vmem_limit,
        ),
    )(f_rows, t_rows, s_rows)

    total = jnp.float32(N * C * H * W)
    dis_loss1 = jnp.sum(partials) / total          # mean(term) + mean(variance)
    dis_loss = dis_loss1 / jnp.float32(N)
    return dis_loss * jnp.float32(alpha_mgd)


def _reference(preds_S, preds_T, new_fea, alpha_mgd=2e-05, a=1.0):
    N = preds_T.shape[0]
    ls = jax.nn.log_softmax(new_fea, axis=1)
    st = jax.nn.softmax(preds_T, axis=1)
    ss = jax.nn.softmax(preds_S, axis=1)
    loss = (ls - st) ** 2
    var = (ls - ss) ** 2
    dis_loss1 = jnp.mean(a * loss + (1 - a) * loss * jnp.exp(-var)) + jnp.mean(var)
    return dis_loss1 / N * alpha_mgd


if __name__ == "__main__":
    key = jax.random.PRNGKey(0)
    k1, k2, k3 = jax.random.split(key, 3)
    N, C, H, W = 2, 4, 16, 16
    preds_S = jax.random.normal(k1, (N, C, H, W), dtype=jnp.float32)
    preds_T = jax.random.normal(k2, (N, C, H, W), dtype=jnp.float32)
    new_fea = jax.random.normal(k3, (N, C, H, W), dtype=jnp.float32)

    out = jax.block_until_ready(bvdkd_loss(preds_S, preds_T, new_fea,
                                           alpha_mgd=2e-05, a=1.0))
    ref = _reference(preds_S, preds_T, new_fea, alpha_mgd=2e-05, a=1.0)
    assert jnp.allclose(out, ref, rtol=1e-5, atol=1e-8), (out, ref)

    # Second config: a != 1, multi-step hw grid with tail masking (HW=160, tile=128).
    k4, k5, k6 = jax.random.split(k3, 3)
    N2, C2, H2, W2 = 2, 4, 16, 10
    pS = jax.random.normal(k4, (N2, C2, H2, W2), dtype=jnp.float32)
    pT = jax.random.normal(k5, (N2, C2, H2, W2), dtype=jnp.float32)
    nF = jax.random.normal(k6, (N2, C2, H2, W2), dtype=jnp.float32)
    out2 = jax.block_until_ready(bvdkd_loss(pS, pT, nF, a=0.7, tile_hw=128))
    ref2 = _reference(pS, pT, nF, a=0.7)
    assert jnp.allclose(out2, ref2, rtol=1e-5, atol=1e-8), (out2, ref2)

    # Third config: bf16 inputs pass through unconverted (kernel upcasts to f32).
    pS16 = pS.astype(jnp.bfloat16)
    pT16 = pT.astype(jnp.bfloat16)
    nF16 = nF.astype(jnp.bfloat16)
    out3 = jax.block_until_ready(bvdkd_loss(pS16, pT16, nF16, a=0.7, tile_hw=128))
    ref3 = _reference(pS16.astype(jnp.float32), pT16.astype(jnp.float32),
                      nF16.astype(jnp.float32), a=0.7)
    assert jnp.allclose(out3, ref3, rtol=1e-4, atol=1e-8), (out3, ref3)

    print("KERNEL_OK")
</pallas_src>

<mosaic_0001>
module attributes {stable_mosaic.version = 11 : i64} {
  func.func @_bvdkd_kernel(%arg0: i32, %arg1: i32, %arg2: memref<1x4x256xf32, #tpu.memory_space<vmem>>, %arg3: memref<1x4x256xf32, #tpu.memory_space<vmem>>, %arg4: memref<1x4x256xf32, #tpu.memory_space<vmem>>, %arg5: memref<1x1x1xf32, #tpu.memory_space<vmem>>) attributes {dimension_semantics = [#tpu.dimension_semantics<parallel>, #tpu.dimension_semantics<parallel>], iteration_bounds = array<i64: 2, 1>, scalar_prefetch = 0 : i64, scratch_operands = 0 : i64, tpu.core_type = #tpu.core_type<tc>, window_params = [{transform_indices = @transform_0, window_bounds = array<i64: 1, 4, 256>}, {transform_indices = @transform_1, window_bounds = array<i64: 1, 4, 256>}, {transform_indices = @transform_2, window_bounds = array<i64: 1, 4, 256>}, {transform_indices = @transform_3, window_bounds = array<i64: 1, 1, 1>}]} {
    %c0 = arith.constant 0 : index
    %c0_0 = arith.constant 0 : index
    %c0_1 = arith.constant 0 : index
    %0 = vector.load %arg2[%c0, %c0_0, %c0_1] : memref<1x4x256xf32, #tpu.memory_space<vmem>>, vector<1x4x256xf32>
    %1 = vector.shape_cast %0 : vector<1x4x256xf32> to vector<4x256xf32>
    %c0_2 = arith.constant 0 : index
    %c0_3 = arith.constant 0 : index
    %c0_4 = arith.constant 0 : index
    %2 = vector.load %arg3[%c0_2, %c0_3, %c0_4] : memref<1x4x256xf32, #tpu.memory_space<vmem>>, vector<1x4x256xf32>
    %3 = vector.shape_cast %2 : vector<1x4x256xf32> to vector<4x256xf32>
    %c0_5 = arith.constant 0 : index
    %c0_6 = arith.constant 0 : index
    %c0_7 = arith.constant 0 : index
    %4 = vector.load %arg4[%c0_5, %c0_6, %c0_7] : memref<1x4x256xf32, #tpu.memory_space<vmem>>, vector<1x4x256xf32>
    %5 = vector.shape_cast %4 : vector<1x4x256xf32> to vector<4x256xf32>
    %cst = arith.constant dense<0xFF800000> : vector<256xf32>
    %6 = vector.multi_reduction <maximumf>, %1, %cst [0] : vector<4x256xf32> to vector<256xf32>
    %7 = vector.shape_cast %6 : vector<256xf32> to vector<1x256xf32>
    %8 = vector.broadcast %7 : vector<1x256xf32> to vector<4x256xf32>
    %9 = arith.subf %1, %8 : vector<4x256xf32>
    %10 = math.exp %9 : vector<4x256xf32>
    %cst_8 = arith.constant dense<0.000000e+00> : vector<256xf32>
    %11 = vector.multi_reduction <add>, %10, %cst_8 [0] : vector<4x256xf32> to vector<256xf32>
    %12 = vector.shape_cast %11 : vector<256xf32> to vector<1x256xf32>
    %13 = math.log %12 : vector<1x256xf32>
    %14 = vector.broadcast %13 : vector<1x256xf32> to vector<4x256xf32>
    %15 = arith.subf %9, %14 : vector<4x256xf32>
    %cst_9 = arith.constant dense<0xFF800000> : vector<256xf32>
    %16 = vector.multi_reduction <maximumf>, %3, %cst_9 [0] : vector<4x256xf32> to vector<256xf32>
    %17 = vector.shape_cast %16 : vector<256xf32> to vector<1x256xf32>
    %18 = vector.broadcast %17 : vector<1x256xf32> to vector<4x256xf32>
    %19 = arith.subf %3, %18 : vector<4x256xf32>
    %20 = math.exp %19 : vector<4x256xf32>
    %cst_10 = arith.constant dense<0.000000e+00> : vector<256xf32>
    %21 = vector.multi_reduction <add>, %20, %cst_10 [0] : vector<4x256xf32> to vector<256xf32>
    %22 = vector.shape_cast %21 : vector<256xf32> to vector<1x256xf32>
    %23 = tpu.reciprocal %22 : vector<1x256xf32> -> vector<1x256xf32>
    %24 = vector.broadcast %23 : vector<1x256xf32> to vector<4x256xf32>
    %25 = arith.mulf %20, %24 : vector<4x256xf32>
    %cst_11 = arith.constant dense<0xFF800000> : vector<256xf32>
    %26 = vector.multi_reduction <maximumf>, %5, %cst_11 [0] : vector<4x256xf32> to vector<256xf32>
    %27 = vector.shape_cast %26 : vector<256xf32> to vector<1x256xf32>
    %28 = vector.broadcast %27 : vector<1x256xf32> to vector<4x256xf32>
    %29 = arith.subf %5, %28 : vector<4x256xf32>
    %30 = math.exp %29 : vector<4x256xf32>
    %cst_12 = arith.constant dense<0.000000e+00> : vector<256xf32>
    %31 = vector.multi_reduction <add>, %30, %cst_12 [0] : vector<4x256xf32> to vector<256xf32>
    %32 = vector.shape_cast %31 : vector<256xf32> to vector<1x256xf32>
    %33 = tpu.reciprocal %32 : vector<1x256xf32> -> vector<1x256xf32>
    %34 = vector.broadcast %33 : vector<1x256xf32> to vector<4x256xf32>
    %35 = arith.mulf %30, %34 : vector<4x256xf32>
    %36 = arith.subf %15, %25 : vector<4x256xf32>
    %37 = arith.mulf %36, %36 : vector<4x256xf32>
    %38 = arith.subf %15, %35 : vector<4x256xf32>
    %39 = arith.mulf %38, %38 : vector<4x256xf32>
    %40 = arith.addf %37, %39 : vector<4x256xf32>
    %41 = vector.shape_cast %40 : vector<4x256xf32> to vector<1x4x256xf32>
    %cst_13 = arith.constant dense<0.000000e+00> : vector<1xf32>
    %42 = vector.multi_reduction <add>, %41, %cst_13 [1, 2] : vector<1x4x256xf32> to vector<1xf32>
    %43 = vector.shape_cast %42 : vector<1xf32> to vector<1x1x1xf32>
    %44 = vector.extract %43[0, 0, 0] : f32 from vector<1x1x1xf32>
    %45 = vector.broadcast %44 : f32 to vector<1x1xf32>
    %c0_14 = arith.constant 0 : index
    %c0_15 = arith.constant 0 : index
    %c0_16 = arith.constant 0 : index
    %46 = vector.load %arg5[%c0_14, %c0_15, %c0_16] : memref<1x1x1xf32, #tpu.memory_space<vmem>>, vector<1x1x1xf32>
    %47 = vector.shape_cast %46 : vector<1x1x1xf32> to vector<1x1xf32>
    %48 = vector.shape_cast %45 : vector<1x1xf32> to vector<1x1x1xf32>
    tpu.vector_store %arg5[%c0_14, %c0_15, %c0_16], %48 {strides = array<i32>} : memref<1x1x1xf32, #tpu.memory_space<vmem>>, vector<1x1x1xf32>,
    return
  }
  func.func @transform_0(%arg0: i32, %arg1: i32) -> (i32, i32, i32) {
    %c0_i32 = arith.constant 0 : i32
    %c0_i32_0 = arith.constant 0 : i32
    return %arg0, %c0_i32, %arg1 : i32, i32, i32
  }
  func.func @transform_1(%arg0: i32, %arg1: i32) -> (i32, i32, i32) {
    %c0_i32 = arith.constant 0 : i32
    %c0_i32_0 = arith.constant 0 : i32
    return %arg0, %c0_i32, %arg1 : i32, i32, i32
  }
  func.func @transform_2(%arg0: i32, %arg1: i32) -> (i32, i32, i32) {
    %c0_i32 = arith.constant 0 : i32
    %c0_i32_0 = arith.constant 0 : i32
    return %arg0, %c0_i32, %arg1 : i32, i32, i32
  }
  func.func @transform_3(%arg0: i32, %arg1: i32) -> (i32, i32, i32) {
    %c1_i32 = arith.constant 1 : i32
    %0 = arith.muli %arg0, %c1_i32 : i32
    %1 = arith.addi %0, %arg1 : i32
    %c0_i32 = arith.constant 0 : i32
    %c0_i32_0 = arith.constant 0 : i32
    %c0_i32_1 = arith.constant 0 : i32
    return %1, %c0_i32, %c0_i32_0 : i32, i32, i32
  }
}

</mosaic_0001>

<bundles_post_ra>
// kernel: tpu_custom_call.1
= control target key start
LH: loop header
LB: loop body
LE: loop exit
PB: predicated region body
PF: predicated region fallthrough
CT: control target
= control target key end

     0   :  { %8 = vsyncpa [#allocation3], 0  ;;  %s1090_s0 = inlined_call_operand.hbm [shape: f32[2,4,256], index: 0, kind: input, shape index: {}]   ;;  %s1091_s1 = inlined_call_operand.hbm [shape: f32[2,4,256], index: 1, kind: input, shape index: {}]   ;;  %s1092_s2 = inlined_call_operand.hbm [shape: f32[2,4,256], index: 2, kind: input, shape index: {}]   ;;  %s1093_s3 = inlined_call_operand.vmem [shape: f32[2,1,1], index: 3, kind: output, shape index: {}]  }
   0x1   :  { %10 = vsyncpa [#allocation3 + $0x1], 0 }
   0x2   :  { %11 = vsyncpa [#allocation5], 0 }
   0x3   :  { %13 = vsyncpa [#allocation5 + $0x1], 0  ;;  %s864_s12 = smov 0   ;;  %s866_s13 = smov 0  }
   0x4   :  { %s868_s14 = smov 0   ;;  %s870_s15 = smov 0  }
   0x5   :  { %s872_s16 = smov 0   ;;  %s874_s17 = smov 0  }
   0x6 LB: > { %s585_s18 = sadd.s32 4294967295, %s839_s17   ;;  %s31_s19 = sadd.s32 1, %s835_s16  ;;  %s839_s17 = sphi %s874_s17, %s19_s17   ;;  %s835_s16 = sphi %s872_s16, %s1110_s16   ;;  %s831_s15 = sphi %s870_s15, %s1109_s15   ;;  %s827_s14 = sphi %s868_s14, %s1108_s14   ;;  %s823_s13 = sphi %s866_s13, %s1107_s13   ;;  %s819_s12 = sphi %s864_s12, %s1106_s12  }
   0x7   : > { %p33_p0 = scmp.ge.s32.totalorder %s31_s19, 2  ;;  %s40_s20 = sadd.s32 1, %s827_s14 }
   0x8   : > { %p47_p1 = scmp.ne.s32.totalorder %s827_s14, %s823_s13  ;;  %p48_p2 = scmp.eq.s32.totalorder %s839_s17, 0 }
   0x9   : > { %s1112_s19 = smov (%p33_p0, %s31_s19), 0  ;;  %p53_p4 = scmp.ne.s32.totalorder %s823_s13, %s819_s12 }
   0xa   : > { %p49_p3 = por %p48_p2, %p47_p1  ;;  %s35_s21 = ssub.s32 %s835_s16, %s1112_s19 }
   0xb   : > { %p54_p5 = scmp.eq.s32.totalorder %s585_s18, 0  ;;  %p38_p6 = scmp.eq.s32.totalorder %s35_s21, 0 }
   0xc   : > { %p625_p8 = scmp.lt.s32.totalorder %s839_s17, 2  ;;  %s161_s24 = sand.u32 1, %s827_s14  }
   0xd   : > { %p905_p7 = por %p54_p5, %p53_p4  ;;  %s915_s25 = sshll.u32 %s835_s16, 7 }
   0xe   : > { %s911_s23 = scalar_select %p38_p6, %s827_s14, %s40_s20  }
   0xf   : > { %s1097_s22 = scalar_select %p905_p7, 1, 0 }
  0x10   : > { %s919_s26 = sshll.u32 %s161_s24, 3  ;;  %p921_p9 = pnand %p625_p8, %p49_p3 }
  0x11   : > { %s182_s28 = sand.u32 1, %s839_s17   ;;  %s930_s4 = scalar_lea.hbm %s1091_s1, %s915_s25 }
  0x12   : > { %s1098_s27 = scalar_select %p921_p9, 1, 0 }
  0x13   : > { %s186_s5 = scalar_lea.vmem [#allocation4], %s919_s26  ;;  %s936_s7 = scalar_lea.sflag [#allocation5], %s182_s28 }
  0x14   : > { %s196_s6 = sshll.u32 %s186_s5, 4  ;;  %s695_s8 = scalar_lea.hbm %s930_s4, 128  ;;  %s933_s6 = int_to_ptr.vmem [resolvable:$true] %s196_s6 }
  0x15   : > { %p696_p11 = scmp.ne.s32.totalorder %s930_s4, %s695_s8  ;;  %p942_p12 = pneg %p921_p9 }
  0x16   : > { %s700_s12 = scalar_lea.hbm %s1091_s1, 256  ;;  %p701_p1 = scmp.lt.u32.totalorder %s930_s4, %s1091_s1 }
  0x17   : > { %p698_p13 = pnand %p942_p12, %p696_p11  ;;  %p702_p2 = scmp.lt.u32.totalorder %s700_s12, %s695_s8 }
  0x18   : > { %p704_p4 = scmp.lt.u32.totalorder %s695_s8, %s930_s4 }
  0x19   : > { %p699_p0 = pneg %p698_p13  ;;  %p703_p3 = por %p702_p2, %p701_p1 }
  0x1b   : > { %p705_p5 = por %p704_p4, %p703_p3 }
  0x1d   : > { %p706_p6 = pnand %p705_p5, %p699_p0 }
  0x1f   : > { %709 = shalt.err (!%p706_p6)
}
  0x20   : > { %s710_s28 = scalar_lea.vmem %s933_s6, 128  ;;  %s841_s29 = smov [#allocation4]  }
  0x21   : > { %p711_p8 = scmp.ne.s32.totalorder %s933_s6, %s710_s28  ;;  %s715_s30 = sshll.u32 %s841_s29, 4  ;;  %s716_s30 = int_to_ptr.vmem [resolvable:$false] %s715_s30 }
  0x22   : > { %s717_s5 = scalar_lea.vmem %s716_s30, 256  ;;  %p718_p10 = scmp.lt.s32.totalorder %s933_s6, %s716_s30 }
  0x23   : > { %p713_p11 = pnand %p711_p8, %p942_p12  ;;  %p719_p7 = scmp.lt.s32.totalorder %s717_s5, %s710_s28 }
  0x25   : > { %p714_p13 = pneg %p713_p11  ;;  %p720_p1 = por %p719_p7, %p718_p10 }
  0x27   : > { %p721_p2 = pnand %p720_p1, %p714_p13 }
  0x29   : > { %724 = shalt.err (!%p721_p2)
}
  0x2a   : > { %621 = dma.hbm_to_vmem [thread:$0]  (!%p921_p9), %s930_s4, 128, %s933_s6, %s936_s7  }
  0x2b   : > { %p222_p0 = scmp.lt.s32.totalorder %s839_s17, 3  ;;  %p1100_p3 = scmp.ge.s32.totalorder %s839_s17, 1 }
  0x2c   : > { %s977_s12 = scalar_lea.hbm %s1090_s0, %s915_s25  ;;  %s165_s20 = scalar_lea.vmem [#allocation2], %s919_s26 }
  0x2d   : > { %p969_p4 = pnand %p1100_p3, %p222_p0  ;;  %s175_s21 = sshll.u32 %s165_s20, 4  ;;  %s176_s21 = int_to_ptr.vmem [resolvable:$true] %s175_s21 }
  0x2e   : > { %s162_s4 = scalar_lea.sflag [#allocation3], %s161_s24  ;;  %s725_s6 = scalar_lea.hbm %s977_s12, 128 }
  0x2f   : > { %s1101_s8 = scalar_select %p969_p4, 1, 0 }
  0x30   : > { %p726_p7 = scmp.ne.s32.totalorder %s977_s12, %s725_s6  ;;  %s730_s30 = scalar_lea.hbm %s1090_s0, 256 }
  0x31   : > { %p731_p6 = scmp.lt.u32.totalorder %s977_s12, %s1090_s0  ;;  %p732_p8 = scmp.lt.u32.totalorder %s730_s30, %s725_s6 }
  0x32   : > { %p728_p10 = pnand %p726_p7, %p942_p12  ;;  %p734_p13 = scmp.lt.u32.totalorder %s725_s6, %s977_s12 }
  0x33   : > { %p733_p11 = por %p732_p8, %p731_p6 }
  0x34   : > { %p729_p5 = pneg %p728_p10 }
  0x35   : > { %p735_p1 = por %p734_p13, %p733_p11 }
  0x37   : > { %p736_p2 = pnand %p735_p1, %p729_p5 }
  0x39   : > { %739 = shalt.err (!%p736_p2)
}
  0x3a   : > { %s740_s24 = scalar_lea.vmem %s176_s21, 128  ;;  %s842_s11 = smov [#allocation2]  }
  0x3b   : > { %p741_p0 = scmp.ne.s32.totalorder %s176_s21, %s740_s24  ;;  %s745_s20 = sshll.u32 %s842_s11, 4  ;;  %s746_s20 = int_to_ptr.vmem [resolvable:$false] %s745_s20 }
  0x3c   : > { %s747_s28 = scalar_lea.vmem %s746_s20, 256  ;;  %p748_p10 = scmp.lt.s32.totalorder %s176_s21, %s746_s20 }
  0x3d   : > { %p743_p3 = pnand %p741_p0, %p942_p12  ;;  %p749_p4 = scmp.lt.s32.totalorder %s747_s28, %s740_s24 }
  0x3f   : > { %p744_p7 = pneg %p743_p3  ;;  %p750_p9 = por %p749_p4, %p748_p10 }
  0x41   : > { %p751_p6 = pnand %p750_p9, %p744_p7 }
  0x43   : > { %754 = shalt.err (!%p751_p6)
}
  0x44   : > { %p1102_p8 = scmp.ne.s32.totalorder %s1098_s27, 0  ;;  %s1003_s30 = scalar_lea.hbm %s1092_s2, %s915_s25 }
  0x45   : > { %s207_s5 = scalar_lea.vmem [#allocation6], %s919_s26  ;;  %s755_s24 = scalar_lea.hbm %s1003_s30, 128 }
  0x46   : > { %618 = dma.hbm_to_vmem [thread:$0]  (!%p1102_p8), %s977_s12, 128, %s176_s21, %s162_s4  }
  0x47   : > { %s217_s10 = sshll.u32 %s207_s5, 4  ;;  %p756_p9 = scmp.ne.s32.totalorder %s1003_s30, %s755_s24  ;;  %s218_s10 = int_to_ptr.vmem [resolvable:$true] %s217_s10 }
  0x48   : > { %s760_s12 = scalar_lea.hbm %s1092_s2, 256  ;;  %p761_p11 = scmp.lt.u32.totalorder %s1003_s30, %s1092_s2 }
  0x49   : > { %p758_p4 = pnand %p756_p9, %p942_p12  ;;  %p762_p13 = scmp.lt.u32.totalorder %s760_s12, %s755_s24 }
  0x4a   : > { %p764_p2 = scmp.lt.u32.totalorder %s755_s24, %s1003_s30 }
  0x4b   : > { %p759_p5 = pneg %p758_p4  ;;  %p763_p1 = por %p762_p13, %p761_p11 }
  0x4d   : > { %p765_p0 = por %p764_p2, %p763_p1 }
  0x4f   : > { %p766_p3 = pnand %p765_p0, %p759_p5 }
  0x51   : > { %769 = shalt.err (!%p766_p3)
}
  0x52   : > { %s770_s25 = scalar_lea.vmem %s218_s10, 128  ;;  %s843_s26 = smov [#allocation6]  }
  0x53   : > { %p771_p7 = scmp.ne.s32.totalorder %s218_s10, %s770_s25  ;;  %s775_s28 = sshll.u32 %s843_s26, 4  ;;  %s776_s28 = int_to_ptr.vmem [resolvable:$false] %s775_s28 }
  0x54   : > { %s777_s6 = scalar_lea.vmem %s776_s28, 256  ;;  %p778_p9 = scmp.lt.s32.totalorder %s218_s10, %s776_s28 }
  0x55   : > { %p773_p10 = pnand %p771_p7, %p942_p12  ;;  %p779_p4 = scmp.lt.s32.totalorder %s777_s6, %s770_s25 }
  0x57   : > { %p774_p6 = pneg %p773_p10  ;;  %p780_p8 = por %p779_p4, %p778_p9 }
  0x59   : > { %p781_p11 = pnand %p780_p8, %p774_p6 }
  0x5b   : > { %784 = shalt.err (!%p781_p11)
}
  0x5c   : > { %p1103_p13 = scmp.ne.s32.totalorder %s1098_s27, 0  ;;  %p1104_p5 = scmp.ne.s32.totalorder %s1101_s8, 0 }
  0x5d   : > { %s228_s9 = sand.u32 (!%p1104_p5), 1, %s823_s13   ;;  %p1105_p12 = scmp.ne.s32.totalorder (!%p1104_p5), %s1097_s22, 0 }
  0x5e   : > { %624 = dma.hbm_to_vmem [thread:$0]  (!%p1103_p13), %s1003_s30, 128, %s218_s10, %s936_s7  }
  0x5f   : > { %226 = sbr.rel (%p1104_p5) target bundleno = 391 (0x187), region = 32  ;;  %s599_s29 = sshll.u32 (!%p1104_p5), %s228_s9, 3 }
  0x60   : > { %s229_s5 = scalar_lea.sflag (!%p1104_p5), [#allocation3], %s228_s9  ;;  %s232_s24 = scalar_lea.vmem (!%p1104_p5), [#allocation2], %s599_s29 }
  0x66   : > { %810 = dma.done.wait (%p1105_p12), %s229_s5, 128  }
  0x67   : > { %812 = vsyncadd (%p1105_p12), %s229_s5, 4294967168  ;;  %s237_s27 = sand.u32 1, %s585_s18   ;;  %s241_s7 = scalar_lea.vmem [#allocation4], %s599_s29 }
  0x68   : > { %s238_s11 = scalar_lea.sflag [#allocation5], %s237_s27 }
  0x69   : > { %814 = dma.done.wait (%p1105_p12), %s238_s11, 256  }
  0x6a   : > { %816 = vsyncadd (%p1105_p12), %s238_s11, 4294967040  ;;  %vm296_vm0 = vcmask 1043456   ;;  %v291_v0 = vld [vmem:[%s241_s7] sm:$0xff]  ;;  %s250_s8 = scalar_lea.vmem [#allocation6], %s599_s29  ;;  %v290_v2 = vld [vmem:[%s232_s24] sm:$0xff]  ;;  %p286_p8 = scmp.lt.s32.totalorder %s831_s15, 1 }
  0x6b   : > { %v292_v1 = vld [vmem:[%s250_s8] sm:$0xff]  ;;  %v345_v3 = vcombine.high %v291_v0, %v291_v0  ;;  %v347_v4 = vsel %vm296_vm0, %v291_v0, -inf  ;;  %v294_v9 = vcombine.high %v290_v2, %v290_v2  ;;  %v297_v10 = vsel %vm296_vm0, %v290_v2, -inf }
  0x6c   : > { %v393_v5 = vcombine.high %v292_v1, %v292_v1  ;;  %v395_v6 = vsel %vm296_vm0, %v292_v1, -inf  ;;  %v348_v7 = vrot.slane %v347_v4, 4  ;;  %v298_v13 = vrot.slane %v297_v10, 4  ;;  %s1114_s15 = smov (!%p286_p8, %s831_s15), 1 }
  0x6d   : > { %v396_v8 = vrot.slane %v395_v6, 4  ;;  %v354_v11 = vsel %vm296_vm0, %v345_v3, -inf  ;;  %v304_v19 = vsel %vm296_vm0, %v294_v9, -inf  ;;  %s288_s30 = scalar_lea.vmem %s1093_s3, %s1114_s15  ;;  %vm461_vm1 = vcmask 0  }
  0x6e   : > { %v402_v12 = vsel %vm296_vm0, %v393_v5, -inf  ;;  %v349_v14 = vmax.f32 %v347_v4, %v348_v7  ;;  %v355_v15 = vrot.slane %v354_v11, 4  ;;  %v299_v18 = vmax.f32 %v297_v10, %v298_v13 }
  0x6f   : > { %v397_v16 = vmax.f32 %v395_v6, %v396_v8  ;;  %v403_v17 = vrot.slane %v402_v12, 4  ;;  %v305_v25 = vrot.slane %v304_v19, 4 }
  0x70   : > { %v350_v20 = vrot.slane %v349_v14, 2  ;;  %v356_v21 = vmax.f32 %v354_v11, %v355_v15  ;;  %v300_v24 = vrot.slane %v299_v18, 2 }
  0x71   : > { %v398_v22 = vrot.slane %v397_v16, 2  ;;  %v404_v23 = vmax.f32 %v402_v12, %v403_v17  ;;  %v306_v31 = vmax.f32 %v304_v19, %v305_v25 }
  0x72   : > { %v351_v26 = vmax.f32 %v349_v14, %v350_v20  ;;  %v357_v27 = vrot.slane %v356_v21, 2  ;;  %v301_v30 = vmax.f32 %v299_v18, %v300_v24 }
  0x73   : > { %v399_v28 = vmax.f32 %v397_v16, %v398_v22  ;;  %v405_v29 = vrot.slane %v404_v23, 2  ;;  %v307_v37 = vrot.slane %v306_v31, 2 }
  0x74   : > { %v352_v32 = vrot.slane %v351_v26, 1  ;;  %v358_v33 = vmax.f32 %v356_v21, %v357_v27  ;;  %v302_v36 = vrot.slane %v301_v30, 1 }
  0x75   : > { %v400_v34 = vrot.slane %v399_v28, 1  ;;  %v406_v35 = vmax.f32 %v404_v23, %v405_v29  ;;  %v308_v42 = vmax.f32 %v306_v31, %v307_v37 }
  0x76   : > { %v353_v38 = vmax.f32 %v351_v26, %v352_v32  ;;  %v359_v39 = vrot.slane %v358_v33, 1  ;;  %v303_v45 = vmax.f32 %v301_v30, %v302_v36 }
  0x77   : > { %v401_v40 = vmax.f32 %v399_v28, %v400_v34  ;;  %v407_v41 = vrot.slane %v406_v35, 1  ;;  %v309_v46 = vrot.slane %v308_v42, 1 }
  0x78   : > { %v360_v43 = vmax.f32 %v358_v33, %v359_v39 }
  0x79   : > { %v408_v44 = vmax.f32 %v406_v35, %v407_v41  ;;  %v310_v49 = vmax.f32 %v308_v42, %v309_v46 }
  0x7a   : > { %v363_v47 = vcombine.low %v353_v38, %v360_v43 }
  0x7b   : > { %v411_v48 = vcombine.low %v401_v40, %v408_v44  ;;  %v313_v52 = vcombine.low %v303_v45, %v310_v49 }
  0x7c   : > { %v365_v50 = vsub.f32 %v291_v0, %v363_v47 }
  0x7d   : > { %v413_v51 = vsub.f32 %v292_v1, %v411_v48  ;;  %v1043_v55 = vsub.f32 %v290_v2, %v313_v52 }
  0x7e   : > { %v366_v53 = vmul.f32 1.442695, %v365_v50 }
  0x7f   : > { %v414_v54 = vmul.f32 1.442695, %v413_v51  ;;  %v316_v56 = vmul.f32 1.442695, %v1043_v55 }
  0x80   : > { %677 = vpow2.f32 %v366_v53 }
  0x81   : > { %679 = vpow2.f32 %v414_v54 }
  0x82   : > { %681 = vpow2.f32 %v316_v56 }
  0x8a   : > { %v1046_v57 = vpop.eup %677 }
  0x8b   : > { %v1048_v58 = vpop.eup %679  ;;  %v369_v59 = vcombine.high %v1046_v57, %v1046_v57  ;;  %v371_v60 = vsel %vm296_vm0, %v1046_v57, 0.0 }
  0x8c   : > { %v372_v61 = vrot.slane %v371_v60, 4  ;;  %v417_v62 = vcombine.high %v1048_v58, %v1048_v58  ;;  %v419_v63 = vsel %vm296_vm0, %v1048_v58, 0.0  ;;  %v682_v0 = vpop.eup %681 }
  0x8d   : > { %v378_v1 = vsel %vm296_vm0, %v369_v59, 0.0  ;;  %v420_v2 = vrot.slane %v419_v63, 4  ;;  %v319_v3 = vcombine.high %v682_v0, %v682_v0  ;;  %v321_v4 = vsel %vm296_vm0, %v682_v0, 0.0 }
  0x8e   : > { %v373_v5 = vadd.f32 %v372_v61, %v371_v60  ;;  %v379_v6 = vrot.slane %v378_v1, 4  ;;  %v322_v7 = vrot.slane %v321_v4, 4  ;;  %v426_v9 = vsel %vm296_vm0, %v417_v62, 0.0 }
  0x8f   : > { %v421_v8 = vadd.f32 %v420_v2, %v419_v63  ;;  %v328_v10 = vsel %vm296_vm0, %v319_v3, 0.0  ;;  %v427_v13 = vrot.slane %v426_v9, 4 }
  0x90   : > { %v374_v11 = vrot.slane %v373_v5, 2  ;;  %v380_v12 = vadd.f32 %v379_v6, %v378_v1  ;;  %v323_v14 = vadd.f32 %v322_v7, %v321_v4  ;;  %v329_v15 = vrot.slane %v328_v10, 4 }
  0x91   : > { %v422_v16 = vrot.slane %v421_v8, 2  ;;  %v428_v19 = vadd.f32 %v427_v13, %v426_v9 }
  0x92   : > { %v375_v17 = vadd.f32 %v374_v11, %v373_v5  ;;  %v381_v18 = vrot.slane %v380_v12, 2  ;;  %v324_v20 = vrot.slane %v323_v14, 2  ;;  %v330_v21 = vadd.f32 %v329_v15, %v328_v10 }
  0x93   : > { %v423_v22 = vadd.f32 %v422_v16, %v421_v8  ;;  %v429_v25 = vrot.slane %v428_v19, 2 }
  0x94   : > { %v376_v23 = vrot.slane %v375_v17, 1  ;;  %v382_v24 = vadd.f32 %v381_v18, %v380_v12  ;;  %v325_v26 = vadd.f32 %v324_v20, %v323_v14  ;;  %v331_v27 = vrot.slane %v330_v21, 2 }
  0x95   : > { %v424_v28 = vrot.slane %v423_v22, 1  ;;  %v430_v31 = vadd.f32 %v429_v25, %v428_v19 }
  0x96   : > { %v377_v29 = vadd.f32 %v376_v23, %v375_v17  ;;  %v383_v30 = vrot.slane %v382_v24, 1  ;;  %v326_v32 = vrot.slane %v325_v26, 1  ;;  %v332_v33 = vadd.f32 %v331_v27, %v330_v21 }
  0x97   : > { %v425_v34 = vadd.f32 %v424_v28, %v423_v22  ;;  %v431_v36 = vrot.slane %v430_v31, 1 }
  0x98   : > { %v384_v35 = vadd.f32 %v383_v30, %v382_v24  ;;  %683 = vrcp.f32 %v377_v29  ;;  %v327_v37 = vadd.f32 %v326_v32, %v325_v26  ;;  %v333_v38 = vrot.slane %v332_v33, 1 }
  0x99   : > { %685 = vrcp.f32 %v425_v34  ;;  %v432_v39 = vadd.f32 %v431_v36, %v430_v31 }
  0x9a   : > { %687 = vrcp.f32 %v384_v35  ;;  %v334_v40 = vadd.f32 %v333_v38, %v332_v33 }
  0x9b   : > { %689 = vlog2.f32 %v327_v37 }
  0x9c   : > { %691 = vrcp.f32 %v432_v39 }
  0x9d   : > { %693 = vlog2.f32 %v334_v40 }
  0xa2   : > { %v684_v41 = vpop.eup %683 }
  0xa3   : > { %v686_v42 = vpop.eup %685 }
  0xa4   : > { %v688_v43 = vpop.eup %687 }
  0xa5   : > { %v690_v44 = vpop.eup %689  ;;  %v389_v47 = vcombine.low %v684_v41, %v688_v43 }
  0xa6   : > { %v692_v45 = vpop.eup %691  ;;  %v336_v46 = vmul.f32 0.6931472, %v690_v44 }
  0xa7   : > { %v694_v48 = vpop.eup %693  ;;  %v437_v49 = vcombine.low %v686_v42, %v692_v45  ;;  %v391_v52 = vmul.f32 %v1046_v57, %v389_v47 }
  0xa8   : > { %v338_v50 = vmul.f32 0.6931472, %v694_v48 }
  0xa9   : > { %v439_v53 = vmul.f32 %v1048_v58, %v437_v49 }
  0xaa   : > { %v341_v51 = vcombine.low %v336_v46, %v338_v50 }
  0xac   : > { %v343_v54 = vsub.f32 %v1043_v55, %v341_v51 }
  0xae   : > { %v440_v56 = vsub.f32 %v343_v54, %v391_v52  ;;  %v442_v59 = vsub.f32 %v343_v54, %v439_v53 }
  0xb0   : > { %v441_v60 = vmul.f32 %v440_v56, %v440_v56  ;;  %v443_v61 = vmul.f32 %v442_v59, %v442_v59 }
  0xb2   : > { %v444_v62 = vadd.f32 %v443_v61, %v441_v60 }
  0xb4   : > { %v446_v63 = vcombine.high %v444_v62, %v444_v62  ;;  %v448_v0 = vsel %vm296_vm0, %v444_v62, 0.0 }
  0xb6   : > { %v449_v1 = vsel %vm296_vm0, %v446_v63, 0.0 }
  0xb7   : > { %v450_v2 = vadd.f32 %v449_v1, %v448_v0 }
  0xb9   : > { %451 = vadd.xlane.f32.xlu0 %v450_v2 }
 0x146   : > { %v452_v3 = vpop.xlane.xlu0 %451 }
 0x147   : > { %v453_v57 = vrot.slane %v452_v3, 4 }
 0x149   : > { %v454_v4 = vadd.f32 %v453_v57, %v452_v3 }
 0x14b   : > { %v455_v58 = vrot.slane %v454_v4, 2 }
 0x14d   : > { %v456_v5 = vadd.f32 %v455_v58, %v454_v4 }
 0x14f   : > { %v457_v55 = vrot.slane %v456_v5, 1 }
 0x151   : > { %v458_v6 = vadd.f32 %v457_v55, %v456_v5 }
 0x153   : > { %607 = vpush %v458_v6 }
 0x184   : > { %s608_s10 = spop %607 }
 0x185   : > { %v460_v7 = vstv %s608_s10 }
 0x186   : > { %462 = vst.msk [vmem:[%s288_s30] sm:$0x1] %vm461_vm1, %v460_v7 }
 0x187 PF: > { %s19_s17 = sadd.s32 1, %s839_s17   ;;  %s1106_s12 = smov %s823_s13 }
 0x188   : > { %p16_p1 = scmp.ge.s32.totalorder %s19_s17, 4   ;;  %s1107_s13 = smov %s827_s14 }
 0x189   : > { %s1108_s14 = smov %s911_s23  ;;  %s1109_s15 = smov %s835_s16 }
 0x18a   : > { %s1110_s16 = smov %s1112_s19  ;;  %18 = sbr.rel (!%p16_p1) target bundleno = 6 (0x6), region = 96 }
 0x191   :  { %483 = vsyncpa [#allocation3], 1 }
 0x192   :  { %485 = vsyncpa [#allocation3 + $0x1], 1 }
 0x193   :  { %486 = vsyncpa [#allocation5], 1 }
 0x194   :  { %488 = vsyncpa [#allocation5 + $0x1], 1 }

</bundles_post_ra>
